<compile_context>
chip_gen: v5e
topology: v5e:2x2
jax: 0.10.0
libtpu: 0.0.40
codegen_flags: <defaults>
</compile_context>

<pallas_src>
import jax
import jax.numpy as jnp
from jax import lax
from jax.experimental import pallas as pl
from jax.experimental.pallas import tpu as pltpu

_LANE = 128
_SUB = 8


def _cdiv(a, b):
    return -(-a // b)


def _inner_product_loss_kernel(pred_ref, gt_ref, src_ref, tgt_ref,
                               row_ref, col_ref, out_ref):
    """One (TB, TL) tile, folded per 128-lane group into a (TB, W) vreg acc."""
    li = pl.program_id(2)                      # innermost reduction axis
    TB, TL = pred_ref.shape
    W = out_ref.shape[-1]                      # 128, or TL when TL < 128
    n_groups = TL // W

    # Hoisted once per tile: lane-broadcast of the per-row valid extents.
    sn = jnp.broadcast_to(src_ref[...], (TB, W))       # (TB, W) int32
    tn = jnp.broadcast_to(tgt_ref[...], (TB, W))       # (TB, W) int32

    def group(off):
        # One (TB, W) lane group.  Out-of-bounds lanes of the boundary blocks
        # hold unspecified data, so the mask must be a select (jnp.where),
        # never a multiply; their row ids are >= N, so they are always masked.
        p = pred_ref[:, pl.ds(off, W)].astype(jnp.float32)
        g = gt_ref[:, pl.ds(off, W)].astype(jnp.float32)
        r = row_ref[:, pl.ds(off, W)]                  # (1, W) flat // M
        c = col_ref[:, pl.ds(off, W)]                  # (1, W) flat %  M
        m = (r < sn) & (c < tn)
        return jnp.where(m, p * g, jnp.float32(0.0))

    if n_groups == 1:
        acc = group(0)
    else:
        # Modest inner unroll (chosen so it divides n_groups and keeps the
        # live vreg set well under the 64-vreg file even at TB = 64).
        u_max = 8 if TB <= 16 else (4 if TB <= 32 else 2)
        unroll = 1
        for cand in (8, 4, 2):
            if cand <= u_max and n_groups % cand == 0:
                unroll = cand
                break

        def body(j, acc):
            base = j * (unroll * W)
            for u in range(unroll):
                acc = acc + group(pl.multiple_of(base + u * W, W))
            return acc

        acc = lax.fori_loop(0, n_groups // unroll, body,
                            jnp.zeros((TB, W), jnp.float32))

    accb = acc[None]                                   # (1, TB, W)

    @pl.when(li == 0)
    def _():
        out_ref[...] = accb                            # assign (no zero pass)

    @pl.when(li != 0)
    def _():
        out_ref[...] += accb


def inner_product_loss(pred_perm, gt_perm, src_ns, tgt_ns):
    """pred_perm, gt_perm: [B, N, M] (f32 or bf16); src_ns, tgt_ns: [B] ints.

    Returns scalar f32 loss matching PyTorch InnerProductLoss.forward.
    (As in the reference, the result is inf/nan if sum(src_ns) == 0.)
    """
    B, N, M = pred_perm.shape
    assert gt_perm.shape == (B, N, M)
    L = N * M

    src_i = jnp.asarray(src_ns).astype(jnp.int32)
    tgt_i = jnp.asarray(tgt_ns).astype(jnp.int32)
    # Mask bounds clamped to the tensor extents (torch slicing clamps too);
    # n_sum below uses the raw src_ns, exactly like the reference.
    src_m = jnp.clip(src_i, 0, N)
    tgt_m = jnp.clip(tgt_i, 0, M)

    ebytes = max(jnp.dtype(pred_perm.dtype).itemsize,
                 jnp.dtype(gt_perm.dtype).itemsize)

    # --- generation-aware scoped-VMEM budget ------------------------------
    try:
        info = pltpu.get_tpu_info()
        vmem_cap = int(getattr(info, "vmem_capacity_bytes", 64 << 20))
    except Exception:  # interpret mode / older jax — conservative default
        vmem_cap = 64 << 20
    vmem_cap = max(vmem_cap, 32 << 20)
    # Request 3/4 of physical VMEM (v7x: 48 MiB, v5e/v6e: 96 MiB) and size the
    # streamed tiles off that same number, leaving >= 12 MiB headroom for the
    # output blocks, scalar blocks, and in-kernel temporaries.
    vmem_limit = int(min(vmem_cap * 3 // 4, 96 << 20))
    stream_budget = max(2 << 20, vmem_limit - (12 << 20))

    # --- batch tiling: cap TB so the (TB, 128) accumulator stays in vregs --
    if B < _SUB:
        TB = B                                  # block dim == array dim (ok)
    else:
        TB = min(64, (B // _SUB) * _SUB)
    GB = _cdiv(B, TB)
    Bp = GB * TB

    # --- lane tiling over the flattened N*M axis ---------------------------
    if L < _LANE:
        TL = W = L
    else:
        W = _LANE
        # Streamed bytes per grid step, double-buffered: pred + gt + row + col.
        per_lane = 2 * (2 * TB * ebytes + 2 * 4)
        TL = stream_budget // per_lane
        TL = max(_LANE, (min(TL, L) // _LANE) * _LANE)
    GL = _cdiv(L, TL)

    # --- optional lane-axis core split (both v7x TCs at small batch) -------
    # Odd GL would duplicate (and mask out) one tail block; only split when
    # that waste is zero or negligible so single-TC chips never pay for it.
    CS = 2 if (GL >= 2 and (GL % 2 == 0 or GL >= 9)) else 1
    GLH = _cdiv(GL, CS)
    Lp = CS * GLH * TL            # id arrays cover every grid lane step

    # --- small side inputs (ONLY these are padded; big inputs stay as-is) --
    pred2 = pred_perm.reshape(B, L)
    gt2 = gt_perm.reshape(B, L)
    src2 = jnp.pad(src_m, (0, Bp - B)).reshape(Bp, 1)   # pad rows -> sn = 0
    tgt2 = jnp.pad(tgt_m, (0, Bp - B)).reshape(Bp, 1)
    idx = jnp.arange(Lp, dtype=jnp.int32)
    row_ids = (idx // M).reshape(1, Lp)   # >= N for any idx >= L -> masked
    col_ids = (idx % M).reshape(1, Lp)

    last_blk = GL - 1
    # pred/gt lane-block index, clamped so a (masked) duplicate of the last
    # block is read instead of an out-of-range block when CS*GLH > GL.
    def data_lane_map(bi, ci, li):
        return (bi, jnp.minimum(ci * GLH + li, last_blk))

    partials = pl.pallas_call(
        _inner_product_loss_kernel,
        out_shape=jax.ShapeDtypeStruct((CS, Bp, W), jnp.float32),
        grid=(GB, CS, GLH),
        in_specs=[
            pl.BlockSpec((TB, TL), data_lane_map),                 # pred
            pl.BlockSpec((TB, TL), data_lane_map),                 # gt
            pl.BlockSpec((TB, 1), lambda bi, ci, li: (bi, 0)),     # src_ns
            pl.BlockSpec((TB, 1), lambda bi, ci, li: (bi, 0)),     # tgt_ns
            pl.BlockSpec((1, TL), lambda bi, ci, li: (0, ci * GLH + li)),  # row
            pl.BlockSpec((1, TL), lambda bi, ci, li: (0, ci * GLH + li)),  # col
        ],
        # Output block fixed across li -> VMEM-resident accumulator; each
        # (bi, ci) owns its own (1, TB, W) slab.
        out_specs=pl.BlockSpec((1, TB, W), lambda bi, ci, li: (ci, bi, 0)),
        compiler_params=pltpu.CompilerParams(
            dimension_semantics=("parallel", "parallel", "arbitrary"),
            vmem_limit_bytes=vmem_limit),
    )(pred2, gt2, src2, tgt2, row_ids, col_ids)

    # Tiny final reduction + divide outside the kernel.
    n_sum = jnp.sum(src_i.astype(jnp.float32))
    return -jnp.sum(partials) / n_sum


def inner_product_loss_ref(pred_perm, gt_perm, src_ns, tgt_ns):
    """Pure-JAX reference mirroring the PyTorch loop."""
    pred_perm = pred_perm.astype(jnp.float32)
    gt_perm = gt_perm.astype(jnp.float32)
    B = pred_perm.shape[0]
    loss = 0.0
    n_sum = 0.0
    for b in range(B):
        sn = int(src_ns[b])
        tn = int(tgt_ns[b])
        loss -= float(jnp.sum(pred_perm[b, :sn, :tn] * gt_perm[b, :sn, :tn]))
        n_sum += float(sn)
    return loss / n_sum


if __name__ == "__main__":
    key = jax.random.PRNGKey(0)

    def run_case(B, N, M, src, tgt, k):
        k1, k2 = jax.random.split(k)
        pred_perm = jax.random.uniform(k1, (B, N, M), dtype=jnp.float32)
        gt_perm = (jax.random.uniform(k2, (B, N, M)) > 0.5).astype(jnp.float32)
        src_ns = jnp.array(src, dtype=jnp.int32)
        tgt_ns = jnp.array(tgt, dtype=jnp.int32)

        # The PyTorch forward's `assert (gt_perm >= 0) & (gt_perm <= 1)`
        # is a host-side input check, done here outside the kernel.
        assert bool(jnp.all((gt_perm >= 0) & (gt_perm <= 1)))

        loss = jax.block_until_ready(
            inner_product_loss(pred_perm, gt_perm, src_ns, tgt_ns))
        ref = inner_product_loss_ref(pred_perm, gt_perm, src_ns, tgt_ns)
        tol = 1e-3 * max(1.0, abs(float(ref)))
        assert abs(float(loss) - float(ref)) < tol, (float(loss), float(ref))

    k1, k2, k3 = jax.random.split(key, 3)
    # Small square case (matches the module's typical permutation inputs).
    run_case(2, 16, 16, [12, 16], [10, 16], k1)
    # Ragged / non-128-aligned case exercising the unpadded-tail + core-split
    # paths (L = 480 -> two lane blocks, masked boundary lanes).
    run_case(3, 24, 20, [12, 24, 7], [10, 20, 20], k2)
    # Tiny case (L < 128) with an over-sized src_n exercising the clamp path.
    run_case(2, 8, 8, [5, 12], [8, 3], k3)

    print("KERNEL_OK")
</pallas_src>

<mosaic_0001>
module attributes {stable_mosaic.version = 11 : i64} {
  func.func @_inner_product_loss_kernel(%arg0: i32, %arg1: i32, %arg2: i32, %arg3: memref<2x256xf32, #tpu.memory_space<vmem>>, %arg4: memref<2x256xf32, #tpu.memory_space<vmem>>, %arg5: memref<2x1xi32, #tpu.memory_space<vmem>>, %arg6: memref<2x1xi32, #tpu.memory_space<vmem>>, %arg7: memref<1x256xi32, #tpu.memory_space<vmem>>, %arg8: memref<1x256xi32, #tpu.memory_space<vmem>>, %arg9: memref<1x2x128xf32, #tpu.memory_space<vmem>>) attributes {dimension_semantics = [#tpu.dimension_semantics<parallel>, #tpu.dimension_semantics<parallel>, #tpu.dimension_semantics<arbitrary>], iteration_bounds = array<i64: 1, 1, 1>, scalar_prefetch = 0 : i64, scratch_operands = 0 : i64, tpu.core_type = #tpu.core_type<tc>, window_params = [{transform_indices = @transform_0, window_bounds = array<i64: 2, 256>}, {transform_indices = @transform_1, window_bounds = array<i64: 2, 256>}, {transform_indices = @transform_2, window_bounds = array<i64: 2, 1>}, {transform_indices = @transform_3, window_bounds = array<i64: 2, 1>}, {transform_indices = @transform_4, window_bounds = array<i64: 1, 256>}, {transform_indices = @transform_5, window_bounds = array<i64: 1, 256>}, {transform_indices = @transform_6, window_bounds = array<i64: 1, 2, 128>}]} {
    %c0 = arith.constant 0 : index
    %c0_0 = arith.constant 0 : index
    %0 = vector.load %arg5[%c0, %c0_0] : memref<2x1xi32, #tpu.memory_space<vmem>>, vector<2x1xi32>
    %1 = vector.shape_cast %0 : vector<2x1xi32> to vector<2x1xi32>
    %2 = vector.broadcast %1 : vector<2x1xi32> to vector<2x128xi32>
    %c0_1 = arith.constant 0 : index
    %c0_2 = arith.constant 0 : index
    %3 = vector.load %arg6[%c0_1, %c0_2] : memref<2x1xi32, #tpu.memory_space<vmem>>, vector<2x1xi32>
    %4 = vector.shape_cast %3 : vector<2x1xi32> to vector<2x1xi32>
    %5 = vector.broadcast %4 : vector<2x1xi32> to vector<2x128xi32>
    %cst = arith.constant 0.000000e+00 : f32
    %6 = vector.broadcast %cst : f32 to vector<2x128xf32>
    %c0_i32 = arith.constant 0 : i32
    %c256_i32 = arith.constant 256 : i32
    %7 = arith.muli %c0_i32, %c256_i32 : i32
    %c0_i32_3 = arith.constant 0 : i32
    %8 = arith.addi %7, %c0_i32_3 : i32
    %9 = tpu.assume_multiple %8, 128 : i32
    %c0_4 = arith.constant 0 : index
    %10 = arith.index_cast %9 : i32 to index
    %11 = vector.load %arg3[%c0_4, %10] : memref<2x256xf32, #tpu.memory_space<vmem>>, vector<2x128xf32>
    %c0_5 = arith.constant 0 : index
    %12 = arith.index_cast %9 : i32 to index
    %13 = vector.load %arg4[%c0_5, %12] : memref<2x256xf32, #tpu.memory_space<vmem>>, vector<2x128xf32>
    %c0_6 = arith.constant 0 : index
    %14 = arith.index_cast %9 : i32 to index
    %15 = vector.load %arg7[%c0_6, %14] : memref<1x256xi32, #tpu.memory_space<vmem>>, vector<1x128xi32>
    %c0_7 = arith.constant 0 : index
    %16 = arith.index_cast %9 : i32 to index
    %17 = vector.load %arg8[%c0_7, %16] : memref<1x256xi32, #tpu.memory_space<vmem>>, vector<1x128xi32>
    %18 = vector.broadcast %15 : vector<1x128xi32> to vector<2x128xi32>
    %19 = arith.cmpi slt, %18, %2 : vector<2x128xi32>
    %20 = vector.broadcast %17 : vector<1x128xi32> to vector<2x128xi32>
    %21 = arith.cmpi slt, %20, %5 : vector<2x128xi32>
    %22 = arith.andi %19, %21 : vector<2x128xi1>
    %23 = arith.mulf %11, %13 : vector<2x128xf32>
    %cst_8 = arith.constant 0.000000e+00 : f32
    %24 = vector.broadcast %cst_8 : f32 to vector<2x128xf32>
    %25 = arith.select %22, %23, %24 : vector<2x128xi1>, vector<2x128xf32>
    %26 = arith.addf %6, %25 : vector<2x128xf32>
    %c128_i32 = arith.constant 128 : i32
    %27 = arith.addi %7, %c128_i32 : i32
    %28 = tpu.assume_multiple %27, 128 : i32
    %c0_9 = arith.constant 0 : index
    %29 = arith.index_cast %28 : i32 to index
    %30 = vector.load %arg3[%c0_9, %29] : memref<2x256xf32, #tpu.memory_space<vmem>>, vector<2x128xf32>
    %c0_10 = arith.constant 0 : index
    %31 = arith.index_cast %28 : i32 to index
    %32 = vector.load %arg4[%c0_10, %31] : memref<2x256xf32, #tpu.memory_space<vmem>>, vector<2x128xf32>
    %c0_11 = arith.constant 0 : index
    %33 = arith.index_cast %28 : i32 to index
    %34 = vector.load %arg7[%c0_11, %33] : memref<1x256xi32, #tpu.memory_space<vmem>>, vector<1x128xi32>
    %c0_12 = arith.constant 0 : index
    %35 = arith.index_cast %28 : i32 to index
    %36 = vector.load %arg8[%c0_12, %35] : memref<1x256xi32, #tpu.memory_space<vmem>>, vector<1x128xi32>
    %37 = vector.broadcast %34 : vector<1x128xi32> to vector<2x128xi32>
    %38 = arith.cmpi slt, %37, %2 : vector<2x128xi32>
    %39 = vector.broadcast %36 : vector<1x128xi32> to vector<2x128xi32>
    %40 = arith.cmpi slt, %39, %5 : vector<2x128xi32>
    %41 = arith.andi %38, %40 : vector<2x128xi1>
    %42 = arith.mulf %30, %32 : vector<2x128xf32>
    %cst_13 = arith.constant 0.000000e+00 : f32
    %43 = vector.broadcast %cst_13 : f32 to vector<2x128xf32>
    %44 = arith.select %41, %42, %43 : vector<2x128xi1>, vector<2x128xf32>
    %45 = arith.addf %26, %44 : vector<2x128xf32>
    %c1_i32 = arith.constant 1 : i32
    %46 = vector.shape_cast %45 : vector<2x128xf32> to vector<1x2x128xf32>
    %c0_i32_14 = arith.constant 0 : i32
    %47 = arith.cmpi eq, %arg2, %c0_i32_14 : i32
    %48 = arith.extui %47 : i1 to i32
    %c0_i32_15 = arith.constant 0 : i32
    %49 = arith.cmpi ne, %48, %c0_i32_15 : i32
    scf.if %49 {
      %c0_18 = arith.constant 0 : index
      %c0_19 = arith.constant 0 : index
      %c0_20 = arith.constant 0 : index
      %53 = vector.load %arg9[%c0_18, %c0_19, %c0_20] : memref<1x2x128xf32, #tpu.memory_space<vmem>>, vector<1x2x128xf32>
      tpu.vector_store %arg9[%c0_18, %c0_19, %c0_20], %46 {strides = array<i32>} : memref<1x2x128xf32, #tpu.memory_space<vmem>>, vector<1x2x128xf32>,
    } else {
    }
    %c0_i32_16 = arith.constant 0 : i32
    %50 = arith.cmpi ne, %arg2, %c0_i32_16 : i32
    %51 = arith.extui %50 : i1 to i32
    %c0_i32_17 = arith.constant 0 : i32
    %52 = arith.cmpi ne, %51, %c0_i32_17 : i32
    scf.if %52 {
      %c0_18 = arith.constant 0 : index
      %c0_19 = arith.constant 0 : index
      %c0_20 = arith.constant 0 : index
      %53 = vector.load %arg9[%c0_18, %c0_19, %c0_20] : memref<1x2x128xf32, #tpu.memory_space<vmem>>, vector<1x2x128xf32>
      %54 = arith.addf %53, %46 : vector<1x2x128xf32>
      %c0_21 = arith.constant 0 : index
      %c0_22 = arith.constant 0 : index
      %c0_23 = arith.constant 0 : index
      %55 = vector.load %arg9[%c0_21, %c0_22, %c0_23] : memref<1x2x128xf32, #tpu.memory_space<vmem>>, vector<1x2x128xf32>
      tpu.vector_store %arg9[%c0_21, %c0_22, %c0_23], %54 {strides = array<i32>} : memref<1x2x128xf32, #tpu.memory_space<vmem>>, vector<1x2x128xf32>,
    } else {
    }
    return
  }
  func.func @transform_0(%arg0: i32, %arg1: i32, %arg2: i32) -> (i32, i32) {
    %c1_i32 = arith.constant 1 : i32
    %0 = arith.muli %arg1, %c1_i32 : i32
    %1 = arith.addi %0, %arg2 : i32
    %c0_i32 = arith.constant 0 : i32
    %2 = arith.minsi %1, %c0_i32 : i32
    %c0_i32_0 = arith.constant 0 : i32
    return %arg0, %2 : i32, i32
  }
  func.func @transform_1(%arg0: i32, %arg1: i32, %arg2: i32) -> (i32, i32) {
    %c1_i32 = arith.constant 1 : i32
    %0 = arith.muli %arg1, %c1_i32 : i32
    %1 = arith.addi %0, %arg2 : i32
    %c0_i32 = arith.constant 0 : i32
    %2 = arith.minsi %1, %c0_i32 : i32
    %c0_i32_0 = arith.constant 0 : i32
    return %arg0, %2 : i32, i32
  }
  func.func @transform_2(%arg0: i32, %arg1: i32, %arg2: i32) -> (i32, i32) {
    %c0_i32 = arith.constant 0 : i32
    %c0_i32_0 = arith.constant 0 : i32
    return %arg0, %c0_i32 : i32, i32
  }
  func.func @transform_3(%arg0: i32, %arg1: i32, %arg2: i32) -> (i32, i32) {
    %c0_i32 = arith.constant 0 : i32
    %c0_i32_0 = arith.constant 0 : i32
    return %arg0, %c0_i32 : i32, i32
  }
  func.func @transform_4(%arg0: i32, %arg1: i32, %arg2: i32) -> (i32, i32) {
    %c1_i32 = arith.constant 1 : i32
    %0 = arith.muli %arg1, %c1_i32 : i32
    %1 = arith.addi %0, %arg2 : i32
    %c0_i32 = arith.constant 0 : i32
    %c0_i32_0 = arith.constant 0 : i32
    return %c0_i32, %1 : i32, i32
  }
  func.func @transform_5(%arg0: i32, %arg1: i32, %arg2: i32) -> (i32, i32) {
    %c1_i32 = arith.constant 1 : i32
    %0 = arith.muli %arg1, %c1_i32 : i32
    %1 = arith.addi %0, %arg2 : i32
    %c0_i32 = arith.constant 0 : i32
    %c0_i32_0 = arith.constant 0 : i32
    return %c0_i32, %1 : i32, i32
  }
  func.func @transform_6(%arg0: i32, %arg1: i32, %arg2: i32) -> (i32, i32, i32) {
    %c0_i32 = arith.constant 0 : i32
    %c0_i32_0 = arith.constant 0 : i32
    return %arg1, %arg0, %c0_i32 : i32, i32, i32
  }
}

</mosaic_0001>

<bundles_post_ra>
// kernel: tpu_custom_call.1
= control target key start
LH: loop header
LB: loop body
LE: loop exit
PB: predicated region body
PF: predicated region fallthrough
CT: control target
= control target key end

     0   :  { %11 = vsyncpa [#allocation3], 0  ;;  %s350_s0 = inlined_call_operand.vmem [shape: f32[2,256], index: 0, kind: input, shape index: {}]   ;;  %s351_s1 = inlined_call_operand.hbm [shape: f32[2,256], index: 1, kind: input, shape index: {}]   ;;  %s352_s2 = inlined_call_operand.vmem [shape: s32[2,1], index: 2, kind: input, shape index: {}]   ;;  %s353_s3 = inlined_call_operand.vmem [shape: s32[2,1], index: 3, kind: input, shape index: {}]   ;;  %s354_s4 = inlined_call_operand.vmem [shape: s32[1,256], index: 4, kind: input, shape index: {}]   ;;  %s355_s5 = inlined_call_operand.hbm [shape: s32[1,256], index: 5, kind: input, shape index: {}]   ;;  %s356_s6 = inlined_call_operand.hbm [shape: f32[1,2,128], index: 6, kind: output, shape index: {}]  }
   0x1   :  { %12 = vsyncpa [#allocation6], 0 }
   0x2   :  { %13 = vsyncpa [#allocation4], 0  ;;  %s39_s23 = sshll.u32 %s351_s1, 4  ;;  %s284_s24 = smov [#allocation2]   ;;  %s40_s23 = int_to_ptr.hbm [resolvable:$true] %s39_s23 }
   0x3   :  { %s41_s25 = sshll.u32 %s284_s24, 4  ;;  %s66_s28 = sshll.u32 %s355_s5, 4  ;;  %s42_s25 = int_to_ptr.vmem [resolvable:$true] %s41_s25  ;;  %s67_s28 = int_to_ptr.hbm [resolvable:$true] %s66_s28 }
   0x4   :  { %44 = dma.hbm_to_vmem [thread:$0]  %s40_s23, 64, %s42_s25, [#allocation3]  }
   0x5   :  { %s285_s29 = smov [#allocation5]  }
   0x6   :  { %s68_s30 = sshll.u32 %s285_s29, 4  ;;  %s69_s30 = int_to_ptr.vmem [resolvable:$true] %s68_s30 }
   0x7   :  { %71 = dma.hbm_to_vmem [thread:$0]  %s67_s28, 32, %s69_s30, [#allocation6]  }
   0x8   :  { %278 = dma.done.wait [#allocation3], 64  }
   0x9   :  { %279 = vsyncadd [#allocation3], 4294967232 }
   0xa   :  { %280 = dma.done.wait [#allocation6], 32  }
   0xb   :  { %281 = vsyncadd [#allocation6], 4294967264  ;;  %v286_v0 = vmov 0   ;;  %v118_v1 = vld [vmem:[%s352_s2] sm:$0x3]  ;;  %s287_s15 = smov [#allocation7]  }
   0xc   :  { %201 = vset.pattern.permute.xlu0 %v286_v0  ;;  %v122_v2 = vld [vmem:[%s353_s3] sm:$0x3]  ;;  %v204_v7 = vld [vmem:[#allocation5] ss:$0 sm:$0xff]  ;;  %v195_v8 = vld [vmem:[%s350_s0 + $0x2] sm:$0x3] }
   0xd   :  { %120 = vperm.xlu0 %201, %v118_v1   ;;  %v202_v4 = vld [vmem:[%s354_s4] ss:$0 sm:$0xff]  ;;  %v141_v9 = vld [vmem:[#allocation2 + $0x2] sm:$0x3]  ;;  %v205_v10 = vld [vmem:[#allocation5 + $0x1] ss:$0 sm:$0xff] }
   0xe   :  { %v126_v5 = vld [vmem:[%s350_s0] sm:$0x3]  ;;  %v151_v13 = vmul.f32 %v195_v8, %v141_v9  ;;  %s171_s16 = sshll.u32 %s287_s15, 4  ;;  %s173_s0 = sshll.u32 %s356_s6, 4  ;;  %s172_s16 = int_to_ptr.vmem [resolvable:$true] %s171_s16  ;;  %s174_s0 = int_to_ptr.hbm [resolvable:$true] %s173_s0 }
   0xf   :  { %v127_v6 = vld [vmem:[#allocation2] sm:$0x3] }
  0x10   :  { %v203_v11 = vld [vmem:[%s354_s4 + $0x1] ss:$0 sm:$0xff]  ;;  %v135_v12 = vmul.f32 %v127_v6, %v126_v5 }
  0x15   :  { %124 = vperm.xlu0 %201, %v122_v2  }
  0x7f   :  { %v121_v3 = vpop.permute.xlu0 %120 }
  0x80   :  { %vm131_vm0 = vcmp.lt.s32.totalorder %v202_v4, %v121_v3  ;;  %vm147_vm3 = vcmp.lt.s32.totalorder %v203_v11, %v121_v3 }
  0x87   :  { %v125_v14 = vpop.permute.xlu0 %124 }
  0x88   :  { %vm133_vm1 = vcmp.lt.s32.totalorder %v204_v7, %v125_v14  ;;  %vm149_vm2 = vcmp.lt.s32.totalorder %v205_v10, %v125_v14 }
  0x89   :  { %vm134_vm4 = vmand %vm131_vm0, %vm133_vm1 }
  0x8a   :  { %v136_v15 = vsel %vm134_vm4, %v135_v12, 0.0  ;;  %vm150_vm5 = vmand %vm147_vm3, %vm149_vm2 }
  0x8b   :  { %v152_v16 = vsel %vm150_vm5, %v151_v13, 0.0 }
  0x8c   :  { %v153_v17 = vadd.f32 %v152_v16, %v136_v15 }
  0x8e   :  { %158 = vst [vmem:[#allocation7] sm:$0x3] %v153_v17 }
  0x8f   :  { %176 = dma.vmem_to_hbm [thread:$0]  %s172_s16, 32, %s174_s0, [#allocation4]  }
  0x90   :  { %282 = dma.done.wait [#allocation4], 32  }
  0x91   :  { %283 = vsyncadd [#allocation4], 4294967264 }
  0x92   :  { %181 = vsyncpa [#allocation3], 1 }
  0x93   :  { %182 = vsyncpa [#allocation6], 1 }
  0x94   :  { %183 = vsyncpa [#allocation4], 1 }

</bundles_post_ra>
